<compile_context>
chip_gen: v7x
topology: tpu7x:2x2x1
jax: 0.10.0
libtpu: 0.0.40
codegen_flags: <defaults>
</compile_context>

<pallas_src>
import jax
import jax.numpy as jnp
from jax.experimental import pallas as pl
from jax.experimental.pallas import tpu as pltpu

# ---- static model sizes (small, consistent with the module) ----
VOCAB_SIZE = 100
EMBED_DIM  = 32
NUM_CLASS  = 4
CONV_OUT   = 32
KSIZE      = 7
PAD        = KSIZE // 2        # padding='same' for odd kernel
BATCH      = 2
SEQ        = 8
SEQ_PAD    = SEQ + 2 * PAD
OUT_LANES  = 128               # lane-dense output slab width


def _text_cls_kernel(ids_ref, emb_ref, wconv_ref, wfc_ref, bias_ref,
                     out_ref, x_scratch):
    # ids_ref:   (BATCH, SEQ) int32 token ids in SMEM (scalar prefetch)
    # emb_ref:   (VOCAB_SIZE, EMBED_DIM) f32 embedding table (VMEM resident)
    # wconv_ref: (KSIZE*EMBED_DIM, CONV_OUT) im2col conv weight
    # wfc_ref:   (CONV_OUT, NUM_CLASS) fc weight (transposed)
    # bias_ref:  (1, OUT_LANES) lane-dense bias slab
    # out_ref:   (BATCH, OUT_LANES) lane-dense output slab
    # x_scratch: (BATCH*SEQ_PAD, EMBED_DIM) gathered + zero-padded embeddings

    # Zero the scratch once: rows never overwritten implement the
    # Conv1d(padding='same') zero padding.
    x_scratch[...] = jnp.zeros_like(x_scratch)

    # Fused embedding gather (dynamic sublane slice per token id).
    for b in range(BATCH):
        base = b * SEQ_PAD
        for s in range(SEQ):
            tok = ids_ref[b, s]
            x_scratch[base + PAD + s:base + PAD + s + 1, :] = (
                emb_ref[pl.ds(tok, 1), :])

    # im2col activation: (B*SEQ, K*E) built from K static shifted slices.
    rows = []
    for b in range(BATCH):
        base = b * SEQ_PAD
        taps = [x_scratch[base + k:base + k + SEQ, :] for k in range(KSIZE)]
        rows.append(jnp.concatenate(taps, axis=-1))           # (SEQ, K*E)
    im2col = jnp.concatenate(rows, axis=0)                    # (B*SEQ, K*E)

    # The whole conv as a single MXU matmul (bias applied later via the slab).
    conv = jnp.dot(im2col, wconv_ref[...],
                   preferred_element_type=jnp.float32)        # (B*SEQ, CONV_OUT)

    # Max over the sequence axis per batch element.  The conv bias is added
    # afterwards -- exact because it is constant over the sequence axis.
    m = jnp.concatenate(
        [jnp.max(conv[b * SEQ:(b + 1) * SEQ, :], axis=0, keepdims=True)
         for b in range(BATCH)], axis=0)                      # (BATCH, CONV_OUT)

    # Dropout: identity (eval mode).  fc on the un-biased max; all biases are
    # restored through the lane-dense bias slab in a single full-width store.
    logits_raw = jnp.dot(m, wfc_ref[...],
                         preferred_element_type=jnp.float32)  # (BATCH, NUM_CLASS)

    pad = jnp.zeros((BATCH, OUT_LANES - NUM_CLASS - CONV_OUT), jnp.float32)
    out_ref[...] = (jnp.concatenate([logits_raw, m, pad], axis=-1)
                    + bias_ref[...])


def text_classification_forward(text, params):
    """text: (B, S) int32 token ids.  Returns (logits (B, num_class),
    feature (B, 32)) — matching the PyTorch forward."""
    emb_table, w_conv, b_conv, w_fc, b_fc = params
    B, S = text.shape
    assert (B, S) == (BATCH, SEQ)

    # conv weight (C_out, E, K) -> im2col (K*E, C_out); fc (C, 32) -> (32, C).
    w_conv_im2col = (jnp.transpose(w_conv, (2, 1, 0))
                     .reshape(KSIZE * EMBED_DIM, CONV_OUT)
                     .astype(jnp.float32))
    w_fc_t = jnp.transpose(w_fc, (1, 0)).astype(jnp.float32)

    # Lane-dense bias slab matching the output layout:
    #   lanes [0:NUM_CLASS)             : b_conv @ W_fc^T + b_fc (effective fc bias)
    #   lanes [NUM_CLASS:NUM_CLASS+32)  : b_conv (added to the maxed feature)
    # Exact only because the conv bias is constant over the sequence axis.
    bfc_eff = b_conv.astype(jnp.float32) @ w_fc_t + b_fc.astype(jnp.float32)
    bias_slab = jnp.zeros((1, OUT_LANES), jnp.float32)
    bias_slab = bias_slab.at[0, :NUM_CLASS].set(bfc_eff)
    bias_slab = bias_slab.at[0, NUM_CLASS:NUM_CLASS + CONV_OUT].set(
        b_conv.astype(jnp.float32))

    slab = pl.pallas_call(
        _text_cls_kernel,
        out_shape=jax.ShapeDtypeStruct((BATCH, OUT_LANES), jnp.float32),
        grid_spec=pltpu.PrefetchScalarGridSpec(
            num_scalar_prefetch=1,          # token ids -> SMEM
            grid=(1,),                      # whole batch in a single grid step
            in_specs=[
                pl.BlockSpec((VOCAB_SIZE, EMBED_DIM), lambda i, ids: (0, 0)),
                pl.BlockSpec((KSIZE * EMBED_DIM, CONV_OUT),
                             lambda i, ids: (0, 0)),
                pl.BlockSpec((CONV_OUT, NUM_CLASS), lambda i, ids: (0, 0)),
                pl.BlockSpec((1, OUT_LANES), lambda i, ids: (0, 0)),
            ],
            out_specs=pl.BlockSpec((BATCH, OUT_LANES), lambda i, ids: (0, 0)),
            scratch_shapes=[
                pltpu.VMEM((BATCH * SEQ_PAD, EMBED_DIM), jnp.float32)],
        ),
        compiler_params=pltpu.CompilerParams(
            dimension_semantics=("arbitrary",)),
    )(text.astype(jnp.int32),
      emb_table.astype(jnp.float32), w_conv_im2col, w_fc_t, bias_slab)

    return slab[:, :NUM_CLASS], slab[:, NUM_CLASS:NUM_CLASS + CONV_OUT]


def _reference_forward(text, params):
    """Independent pure-JAX reference of the PyTorch forward (eval mode)."""
    emb_table, w_conv, b_conv, w_fc, b_fc = params
    x = emb_table[text]                                         # (B, S, E)
    x_pad = jnp.pad(x, ((0, 0), (PAD, PAD), (0, 0)))            # (B, S+2P, E)
    conv = b_conv[None, None, :] + sum(
        jnp.einsum('bse,oe->bso', x_pad[:, k:k + SEQ, :], w_conv[:, :, k])
        for k in range(KSIZE))                                  # (B, S, 32)
    feat = conv.max(axis=1)                                     # (B, 32)
    logits = feat @ w_fc.T + b_fc                               # (B, num_class)
    return logits, feat


def init_params(key):
    """Deterministic parameter init mirroring the module's init_weights()."""
    k_emb, k_cw, k_cb, k_fw = jax.random.split(key, 4)
    initrange = 0.5
    # nn.Embedding weight ~ U(-0.5, 0.5)
    emb_table = jax.random.uniform(k_emb, (VOCAB_SIZE, EMBED_DIM),
                                   jnp.float32, -initrange, initrange)
    # Conv1d default init (kaiming-uniform-like bound 1/sqrt(fan_in))
    fan_in = EMBED_DIM * KSIZE
    bound = 1.0 / jnp.sqrt(jnp.float32(fan_in))
    w_conv = jax.random.uniform(k_cw, (CONV_OUT, EMBED_DIM, KSIZE),
                                jnp.float32, -bound, bound)
    b_conv = jax.random.uniform(k_cb, (CONV_OUT,), jnp.float32, -bound, bound)
    # fc weight ~ U(-0.5, 0.5), bias = 0
    w_fc = jax.random.uniform(k_fw, (NUM_CLASS, CONV_OUT),
                              jnp.float32, -initrange, initrange)
    b_fc = jnp.zeros((NUM_CLASS,), jnp.float32)
    return emb_table, w_conv, b_conv, w_fc, b_fc


if __name__ == "__main__":
    key = jax.random.PRNGKey(0)
    k_params, k_text = jax.random.split(key)
    params = init_params(k_params)
    text = jax.random.randint(k_text, (BATCH, SEQ), 0, VOCAB_SIZE, jnp.int32)

    logits, feature = jax.jit(text_classification_forward)(text, params)
    jax.block_until_ready((logits, feature))

    assert logits.shape == (BATCH, NUM_CLASS)
    assert feature.shape == (BATCH, CONV_OUT)

    ref_logits, ref_feature = _reference_forward(text, params)
    assert jnp.allclose(logits, ref_logits, atol=1e-3, rtol=1e-3)
    assert jnp.allclose(feature, ref_feature, atol=1e-3, rtol=1e-3)
    print("KERNEL_OK")
</pallas_src>

<mosaic_0001>
module attributes {stable_mosaic.version = 11 : i64} {
  func.func @_text_cls_kernel(%arg0: i32, %arg1: memref<2x8xi32, #tpu.memory_space<smem>>, %arg2: memref<100x32xf32, #tpu.memory_space<vmem>>, %arg3: memref<224x32xf32, #tpu.memory_space<vmem>>, %arg4: memref<32x4xf32, #tpu.memory_space<vmem>>, %arg5: memref<1x128xf32, #tpu.memory_space<vmem>>, %arg6: memref<2x128xf32, #tpu.memory_space<vmem>>, %arg7: memref<28x32xf32, #tpu.memory_space<vmem>>) attributes {dimension_semantics = [#tpu.dimension_semantics<arbitrary>], iteration_bounds = array<i64: 1>, scalar_prefetch = 1 : i64, scratch_operands = 1 : i64, tpu.core_type = #tpu.core_type<tc>, window_params = [{pipeline_mode = #tpu.pipeline_mode<synchronous>, transform_indices = @transform_0, window_bounds = array<i64: 100, 32>}, {pipeline_mode = #tpu.pipeline_mode<synchronous>, transform_indices = @transform_1, window_bounds = array<i64: 224, 32>}, {pipeline_mode = #tpu.pipeline_mode<synchronous>, transform_indices = @transform_2, window_bounds = array<i64: 32, 4>}, {pipeline_mode = #tpu.pipeline_mode<synchronous>, transform_indices = @transform_3, window_bounds = array<i64: 1, 128>}, {pipeline_mode = #tpu.pipeline_mode<synchronous>, transform_indices = @transform_4, window_bounds = array<i64: 2, 128>}]} {
    %cst = arith.constant 0.000000e+00 : f32
    %0 = vector.broadcast %cst : f32 to vector<28x32xf32>
    %c0 = arith.constant 0 : index
    %c0_0 = arith.constant 0 : index
    %1 = vector.load %arg7[%c0, %c0_0] : memref<28x32xf32, #tpu.memory_space<vmem>>, vector<28x32xf32>
    tpu.vector_store %arg7[%c0, %c0_0], %0 {strides = array<i32>} : memref<28x32xf32, #tpu.memory_space<vmem>>, vector<28x32xf32>,
    %c0_1 = arith.constant 0 : index
    %c0_2 = arith.constant 0 : index
    %2 = memref.load %arg1[%c0_1, %c0_2] : memref<2x8xi32, #tpu.memory_space<smem>>
    %3 = arith.index_cast %2 : i32 to index
    %c0_3 = arith.constant 0 : index
    %4 = vector.load %arg2[%3, %c0_3] : memref<100x32xf32, #tpu.memory_space<vmem>>, vector<1x32xf32>
    %c3 = arith.constant 3 : index
    %c0_4 = arith.constant 0 : index
    %5 = vector.load %arg7[%c3, %c0_4] : memref<28x32xf32, #tpu.memory_space<vmem>>, vector<1x32xf32>
    tpu.vector_store %arg7[%c3, %c0_4], %4 {strides = array<i32>} : memref<28x32xf32, #tpu.memory_space<vmem>>, vector<1x32xf32>,
    %c0_5 = arith.constant 0 : index
    %c1 = arith.constant 1 : index
    %6 = memref.load %arg1[%c0_5, %c1] : memref<2x8xi32, #tpu.memory_space<smem>>
    %7 = arith.index_cast %6 : i32 to index
    %c0_6 = arith.constant 0 : index
    %8 = vector.load %arg2[%7, %c0_6] : memref<100x32xf32, #tpu.memory_space<vmem>>, vector<1x32xf32>
    %c4 = arith.constant 4 : index
    %c0_7 = arith.constant 0 : index
    %9 = vector.load %arg7[%c4, %c0_7] : memref<28x32xf32, #tpu.memory_space<vmem>>, vector<1x32xf32>
    tpu.vector_store %arg7[%c4, %c0_7], %8 {strides = array<i32>} : memref<28x32xf32, #tpu.memory_space<vmem>>, vector<1x32xf32>,
    %c0_8 = arith.constant 0 : index
    %c2 = arith.constant 2 : index
    %10 = memref.load %arg1[%c0_8, %c2] : memref<2x8xi32, #tpu.memory_space<smem>>
    %11 = arith.index_cast %10 : i32 to index
    %c0_9 = arith.constant 0 : index
    %12 = vector.load %arg2[%11, %c0_9] : memref<100x32xf32, #tpu.memory_space<vmem>>, vector<1x32xf32>
    %c5 = arith.constant 5 : index
    %c0_10 = arith.constant 0 : index
    %13 = vector.load %arg7[%c5, %c0_10] : memref<28x32xf32, #tpu.memory_space<vmem>>, vector<1x32xf32>
    tpu.vector_store %arg7[%c5, %c0_10], %12 {strides = array<i32>} : memref<28x32xf32, #tpu.memory_space<vmem>>, vector<1x32xf32>,
    %c0_11 = arith.constant 0 : index
    %c3_12 = arith.constant 3 : index
    %14 = memref.load %arg1[%c0_11, %c3_12] : memref<2x8xi32, #tpu.memory_space<smem>>
    %15 = arith.index_cast %14 : i32 to index
    %c0_13 = arith.constant 0 : index
    %16 = vector.load %arg2[%15, %c0_13] : memref<100x32xf32, #tpu.memory_space<vmem>>, vector<1x32xf32>
    %c6 = arith.constant 6 : index
    %c0_14 = arith.constant 0 : index
    %17 = vector.load %arg7[%c6, %c0_14] : memref<28x32xf32, #tpu.memory_space<vmem>>, vector<1x32xf32>
    tpu.vector_store %arg7[%c6, %c0_14], %16 {strides = array<i32>} : memref<28x32xf32, #tpu.memory_space<vmem>>, vector<1x32xf32>,
    %c0_15 = arith.constant 0 : index
    %c4_16 = arith.constant 4 : index
    %18 = memref.load %arg1[%c0_15, %c4_16] : memref<2x8xi32, #tpu.memory_space<smem>>
    %19 = arith.index_cast %18 : i32 to index
    %c0_17 = arith.constant 0 : index
    %20 = vector.load %arg2[%19, %c0_17] : memref<100x32xf32, #tpu.memory_space<vmem>>, vector<1x32xf32>
    %c7 = arith.constant 7 : index
    %c0_18 = arith.constant 0 : index
    %21 = vector.load %arg7[%c7, %c0_18] : memref<28x32xf32, #tpu.memory_space<vmem>>, vector<1x32xf32>
    tpu.vector_store %arg7[%c7, %c0_18], %20 {strides = array<i32>} : memref<28x32xf32, #tpu.memory_space<vmem>>, vector<1x32xf32>,
    %c0_19 = arith.constant 0 : index
    %c5_20 = arith.constant 5 : index
    %22 = memref.load %arg1[%c0_19, %c5_20] : memref<2x8xi32, #tpu.memory_space<smem>>
    %23 = arith.index_cast %22 : i32 to index
    %c0_21 = arith.constant 0 : index
    %24 = vector.load %arg2[%23, %c0_21] : memref<100x32xf32, #tpu.memory_space<vmem>>, vector<1x32xf32>
    %c8 = arith.constant 8 : index
    %c0_22 = arith.constant 0 : index
    %25 = vector.load %arg7[%c8, %c0_22] : memref<28x32xf32, #tpu.memory_space<vmem>>, vector<1x32xf32>
    tpu.vector_store %arg7[%c8, %c0_22], %24 {strides = array<i32>} : memref<28x32xf32, #tpu.memory_space<vmem>>, vector<1x32xf32>,
    %c0_23 = arith.constant 0 : index
    %c6_24 = arith.constant 6 : index
    %26 = memref.load %arg1[%c0_23, %c6_24] : memref<2x8xi32, #tpu.memory_space<smem>>
    %27 = arith.index_cast %26 : i32 to index
    %c0_25 = arith.constant 0 : index
    %28 = vector.load %arg2[%27, %c0_25] : memref<100x32xf32, #tpu.memory_space<vmem>>, vector<1x32xf32>
    %c9 = arith.constant 9 : index
    %c0_26 = arith.constant 0 : index
    %29 = vector.load %arg7[%c9, %c0_26] : memref<28x32xf32, #tpu.memory_space<vmem>>, vector<1x32xf32>
    tpu.vector_store %arg7[%c9, %c0_26], %28 {strides = array<i32>} : memref<28x32xf32, #tpu.memory_space<vmem>>, vector<1x32xf32>,
    %c0_27 = arith.constant 0 : index
    %c7_28 = arith.constant 7 : index
    %30 = memref.load %arg1[%c0_27, %c7_28] : memref<2x8xi32, #tpu.memory_space<smem>>
    %31 = arith.index_cast %30 : i32 to index
    %c0_29 = arith.constant 0 : index
    %32 = vector.load %arg2[%31, %c0_29] : memref<100x32xf32, #tpu.memory_space<vmem>>, vector<1x32xf32>
    %c10 = arith.constant 10 : index
    %c0_30 = arith.constant 0 : index
    %33 = vector.load %arg7[%c10, %c0_30] : memref<28x32xf32, #tpu.memory_space<vmem>>, vector<1x32xf32>
    tpu.vector_store %arg7[%c10, %c0_30], %32 {strides = array<i32>} : memref<28x32xf32, #tpu.memory_space<vmem>>, vector<1x32xf32>,
    %c1_31 = arith.constant 1 : index
    %c0_32 = arith.constant 0 : index
    %34 = memref.load %arg1[%c1_31, %c0_32] : memref<2x8xi32, #tpu.memory_space<smem>>
    %35 = arith.index_cast %34 : i32 to index
    %c0_33 = arith.constant 0 : index
    %36 = vector.load %arg2[%35, %c0_33] : memref<100x32xf32, #tpu.memory_space<vmem>>, vector<1x32xf32>
    %c17 = arith.constant 17 : index
    %c0_34 = arith.constant 0 : index
    %37 = vector.load %arg7[%c17, %c0_34] : memref<28x32xf32, #tpu.memory_space<vmem>>, vector<1x32xf32>
    tpu.vector_store %arg7[%c17, %c0_34], %36 {strides = array<i32>} : memref<28x32xf32, #tpu.memory_space<vmem>>, vector<1x32xf32>,
    %c1_35 = arith.constant 1 : index
    %c1_36 = arith.constant 1 : index
    %38 = memref.load %arg1[%c1_35, %c1_36] : memref<2x8xi32, #tpu.memory_space<smem>>
    %39 = arith.index_cast %38 : i32 to index
    %c0_37 = arith.constant 0 : index
    %40 = vector.load %arg2[%39, %c0_37] : memref<100x32xf32, #tpu.memory_space<vmem>>, vector<1x32xf32>
    %c18 = arith.constant 18 : index
    %c0_38 = arith.constant 0 : index
    %41 = vector.load %arg7[%c18, %c0_38] : memref<28x32xf32, #tpu.memory_space<vmem>>, vector<1x32xf32>
    tpu.vector_store %arg7[%c18, %c0_38], %40 {strides = array<i32>} : memref<28x32xf32, #tpu.memory_space<vmem>>, vector<1x32xf32>,
    %c1_39 = arith.constant 1 : index
    %c2_40 = arith.constant 2 : index
    %42 = memref.load %arg1[%c1_39, %c2_40] : memref<2x8xi32, #tpu.memory_space<smem>>
    %43 = arith.index_cast %42 : i32 to index
    %c0_41 = arith.constant 0 : index
    %44 = vector.load %arg2[%43, %c0_41] : memref<100x32xf32, #tpu.memory_space<vmem>>, vector<1x32xf32>
    %c19 = arith.constant 19 : index
    %c0_42 = arith.constant 0 : index
    %45 = vector.load %arg7[%c19, %c0_42] : memref<28x32xf32, #tpu.memory_space<vmem>>, vector<1x32xf32>
    tpu.vector_store %arg7[%c19, %c0_42], %44 {strides = array<i32>} : memref<28x32xf32, #tpu.memory_space<vmem>>, vector<1x32xf32>,
    %c1_43 = arith.constant 1 : index
    %c3_44 = arith.constant 3 : index
    %46 = memref.load %arg1[%c1_43, %c3_44] : memref<2x8xi32, #tpu.memory_space<smem>>
    %47 = arith.index_cast %46 : i32 to index
    %c0_45 = arith.constant 0 : index
    %48 = vector.load %arg2[%47, %c0_45] : memref<100x32xf32, #tpu.memory_space<vmem>>, vector<1x32xf32>
    %c20 = arith.constant 20 : index
    %c0_46 = arith.constant 0 : index
    %49 = vector.load %arg7[%c20, %c0_46] : memref<28x32xf32, #tpu.memory_space<vmem>>, vector<1x32xf32>
    tpu.vector_store %arg7[%c20, %c0_46], %48 {strides = array<i32>} : memref<28x32xf32, #tpu.memory_space<vmem>>, vector<1x32xf32>,
    %c1_47 = arith.constant 1 : index
    %c4_48 = arith.constant 4 : index
    %50 = memref.load %arg1[%c1_47, %c4_48] : memref<2x8xi32, #tpu.memory_space<smem>>
    %51 = arith.index_cast %50 : i32 to index
    %c0_49 = arith.constant 0 : index
    %52 = vector.load %arg2[%51, %c0_49] : memref<100x32xf32, #tpu.memory_space<vmem>>, vector<1x32xf32>
    %c21 = arith.constant 21 : index
    %c0_50 = arith.constant 0 : index
    %53 = vector.load %arg7[%c21, %c0_50] : memref<28x32xf32, #tpu.memory_space<vmem>>, vector<1x32xf32>
    tpu.vector_store %arg7[%c21, %c0_50], %52 {strides = array<i32>} : memref<28x32xf32, #tpu.memory_space<vmem>>, vector<1x32xf32>,
    %c1_51 = arith.constant 1 : index
    %c5_52 = arith.constant 5 : index
    %54 = memref.load %arg1[%c1_51, %c5_52] : memref<2x8xi32, #tpu.memory_space<smem>>
    %55 = arith.index_cast %54 : i32 to index
    %c0_53 = arith.constant 0 : index
    %56 = vector.load %arg2[%55, %c0_53] : memref<100x32xf32, #tpu.memory_space<vmem>>, vector<1x32xf32>
    %c22 = arith.constant 22 : index
    %c0_54 = arith.constant 0 : index
    %57 = vector.load %arg7[%c22, %c0_54] : memref<28x32xf32, #tpu.memory_space<vmem>>, vector<1x32xf32>
    tpu.vector_store %arg7[%c22, %c0_54], %56 {strides = array<i32>} : memref<28x32xf32, #tpu.memory_space<vmem>>, vector<1x32xf32>,
    %c1_55 = arith.constant 1 : index
    %c6_56 = arith.constant 6 : index
    %58 = memref.load %arg1[%c1_55, %c6_56] : memref<2x8xi32, #tpu.memory_space<smem>>
    %59 = arith.index_cast %58 : i32 to index
    %c0_57 = arith.constant 0 : index
    %60 = vector.load %arg2[%59, %c0_57] : memref<100x32xf32, #tpu.memory_space<vmem>>, vector<1x32xf32>
    %c23 = arith.constant 23 : index
    %c0_58 = arith.constant 0 : index
    %61 = vector.load %arg7[%c23, %c0_58] : memref<28x32xf32, #tpu.memory_space<vmem>>, vector<1x32xf32>
    tpu.vector_store %arg7[%c23, %c0_58], %60 {strides = array<i32>} : memref<28x32xf32, #tpu.memory_space<vmem>>, vector<1x32xf32>,
    %c1_59 = arith.constant 1 : index
    %c7_60 = arith.constant 7 : index
    %62 = memref.load %arg1[%c1_59, %c7_60] : memref<2x8xi32, #tpu.memory_space<smem>>
    %63 = arith.index_cast %62 : i32 to index
    %c0_61 = arith.constant 0 : index
    %64 = vector.load %arg2[%63, %c0_61] : memref<100x32xf32, #tpu.memory_space<vmem>>, vector<1x32xf32>
    %c24 = arith.constant 24 : index
    %c0_62 = arith.constant 0 : index
    %65 = vector.load %arg7[%c24, %c0_62] : memref<28x32xf32, #tpu.memory_space<vmem>>, vector<1x32xf32>
    tpu.vector_store %arg7[%c24, %c0_62], %64 {strides = array<i32>} : memref<28x32xf32, #tpu.memory_space<vmem>>, vector<1x32xf32>,
    %c0_63 = arith.constant 0 : index
    %c0_64 = arith.constant 0 : index
    %66 = vector.load %arg7[%c0_63, %c0_64] : memref<28x32xf32, #tpu.memory_space<vmem>>, vector<8x32xf32>
    %c1_65 = arith.constant 1 : index
    %c0_66 = arith.constant 0 : index
    %67 = vector.load %arg7[%c1_65, %c0_66] : memref<28x32xf32, #tpu.memory_space<vmem>>, vector<8x32xf32>
    %c2_67 = arith.constant 2 : index
    %c0_68 = arith.constant 0 : index
    %68 = vector.load %arg7[%c2_67, %c0_68] : memref<28x32xf32, #tpu.memory_space<vmem>>, vector<8x32xf32>
    %c3_69 = arith.constant 3 : index
    %c0_70 = arith.constant 0 : index
    %69 = vector.load %arg7[%c3_69, %c0_70] : memref<28x32xf32, #tpu.memory_space<vmem>>, vector<8x32xf32>
    %c4_71 = arith.constant 4 : index
    %c0_72 = arith.constant 0 : index
    %70 = vector.load %arg7[%c4_71, %c0_72] : memref<28x32xf32, #tpu.memory_space<vmem>>, vector<8x32xf32>
    %c5_73 = arith.constant 5 : index
    %c0_74 = arith.constant 0 : index
    %71 = vector.load %arg7[%c5_73, %c0_74] : memref<28x32xf32, #tpu.memory_space<vmem>>, vector<8x32xf32>
    %c6_75 = arith.constant 6 : index
    %c0_76 = arith.constant 0 : index
    %72 = vector.load %arg7[%c6_75, %c0_76] : memref<28x32xf32, #tpu.memory_space<vmem>>, vector<8x32xf32>
    %73 = tpu.concatenate %66, %67, %68, %69, %70, %71, %72 in 1 : vector<8x32xf32>, vector<8x32xf32>, vector<8x32xf32>, vector<8x32xf32>, vector<8x32xf32>, vector<8x32xf32>, vector<8x32xf32> -> vector<8x224xf32>
    %c14 = arith.constant 14 : index
    %c0_77 = arith.constant 0 : index
    %74 = vector.load %arg7[%c14, %c0_77] : memref<28x32xf32, #tpu.memory_space<vmem>>, vector<8x32xf32>
    %c15 = arith.constant 15 : index
    %c0_78 = arith.constant 0 : index
    %75 = vector.load %arg7[%c15, %c0_78] : memref<28x32xf32, #tpu.memory_space<vmem>>, vector<8x32xf32>
    %c16 = arith.constant 16 : index
    %c0_79 = arith.constant 0 : index
    %76 = vector.load %arg7[%c16, %c0_79] : memref<28x32xf32, #tpu.memory_space<vmem>>, vector<8x32xf32>
    %c17_80 = arith.constant 17 : index
    %c0_81 = arith.constant 0 : index
    %77 = vector.load %arg7[%c17_80, %c0_81] : memref<28x32xf32, #tpu.memory_space<vmem>>, vector<8x32xf32>
    %c18_82 = arith.constant 18 : index
    %c0_83 = arith.constant 0 : index
    %78 = vector.load %arg7[%c18_82, %c0_83] : memref<28x32xf32, #tpu.memory_space<vmem>>, vector<8x32xf32>
    %c19_84 = arith.constant 19 : index
    %c0_85 = arith.constant 0 : index
    %79 = vector.load %arg7[%c19_84, %c0_85] : memref<28x32xf32, #tpu.memory_space<vmem>>, vector<8x32xf32>
    %c20_86 = arith.constant 20 : index
    %c0_87 = arith.constant 0 : index
    %80 = vector.load %arg7[%c20_86, %c0_87] : memref<28x32xf32, #tpu.memory_space<vmem>>, vector<8x32xf32>
    %81 = tpu.concatenate %74, %75, %76, %77, %78, %79, %80 in 1 : vector<8x32xf32>, vector<8x32xf32>, vector<8x32xf32>, vector<8x32xf32>, vector<8x32xf32>, vector<8x32xf32>, vector<8x32xf32> -> vector<8x224xf32>
    %82 = tpu.concatenate %73, %81 in 0 : vector<8x224xf32>, vector<8x224xf32> -> vector<16x224xf32>
    %c0_88 = arith.constant 0 : index
    %c0_89 = arith.constant 0 : index
    %83 = vector.load %arg3[%c0_88, %c0_89] : memref<224x32xf32, #tpu.memory_space<vmem>>, vector<224x32xf32>
    %cst_90 = arith.constant dense<0.000000e+00> : vector<16x32xf32>
    %84 = tpu.matmul %82, %83, %cst_90 {dimension_numbers = #tpu.dot_dimension_numbers<[1], [0], [0], [1], [0, 0, 1, 1], [], []>} : vector<16x224xf32>, vector<224x32xf32>, vector<16x32xf32> -> vector<16x32xf32>
    %85 = vector.extract_strided_slice %84 {offsets = [0, 0], sizes = [8, 32], strides = [1, 1]} : vector<16x32xf32> to vector<8x32xf32>
    %cst_91 = arith.constant dense<0xFF800000> : vector<32xf32>
    %86 = vector.multi_reduction <maximumf>, %85, %cst_91 [0] : vector<8x32xf32> to vector<32xf32>
    %87 = vector.shape_cast %86 : vector<32xf32> to vector<1x32xf32>
    %88 = vector.extract_strided_slice %84 {offsets = [8, 0], sizes = [8, 32], strides = [1, 1]} : vector<16x32xf32> to vector<8x32xf32>
    %cst_92 = arith.constant dense<0xFF800000> : vector<32xf32>
    %89 = vector.multi_reduction <maximumf>, %88, %cst_92 [0] : vector<8x32xf32> to vector<32xf32>
    %90 = vector.shape_cast %89 : vector<32xf32> to vector<1x32xf32>
    %91 = tpu.concatenate %87, %90 in 0 : vector<1x32xf32>, vector<1x32xf32> -> vector<2x32xf32>
    %c0_93 = arith.constant 0 : index
    %c0_94 = arith.constant 0 : index
    %92 = vector.load %arg4[%c0_93, %c0_94] : memref<32x4xf32, #tpu.memory_space<vmem>>, vector<32x4xf32>
    %cst_95 = arith.constant dense<0.000000e+00> : vector<2x4xf32>
    %93 = tpu.matmul %91, %92, %cst_95 {dimension_numbers = #tpu.dot_dimension_numbers<[1], [0], [0], [1], [0, 0, 1, 1], [], []>} : vector<2x32xf32>, vector<32x4xf32>, vector<2x4xf32> -> vector<2x4xf32>
    %cst_96 = arith.constant 0.000000e+00 : f32
    %94 = vector.broadcast %cst_96 : f32 to vector<2x92xf32>
    %95 = tpu.concatenate %93, %91, %94 in 1 : vector<2x4xf32>, vector<2x32xf32>, vector<2x92xf32> -> vector<2x128xf32>
    %c0_97 = arith.constant 0 : index
    %c0_98 = arith.constant 0 : index
    %96 = vector.load %arg5[%c0_97, %c0_98] : memref<1x128xf32, #tpu.memory_space<vmem>>, vector<1x128xf32>
    %97 = vector.broadcast %96 : vector<1x128xf32> to vector<2x128xf32>
    %98 = arith.addf %95, %97 : vector<2x128xf32>
    %c0_99 = arith.constant 0 : index
    %c0_100 = arith.constant 0 : index
    %99 = vector.load %arg6[%c0_99, %c0_100] : memref<2x128xf32, #tpu.memory_space<vmem>>, vector<2x128xf32>
    tpu.vector_store %arg6[%c0_99, %c0_100], %98 {strides = array<i32>} : memref<2x128xf32, #tpu.memory_space<vmem>>, vector<2x128xf32>,
    return
  }
  func.func @transform_0(%arg0: i32, %arg1: memref<2x8xi32, #tpu.memory_space<smem>>) -> (i32, i32) {
    %c0_i32 = arith.constant 0 : i32
    %c0_i32_0 = arith.constant 0 : i32
    %c0_i32_1 = arith.constant 0 : i32
    return %c0_i32, %c0_i32_0 : i32, i32
  }
  func.func @transform_1(%arg0: i32, %arg1: memref<2x8xi32, #tpu.memory_space<smem>>) -> (i32, i32) {
    %c0_i32 = arith.constant 0 : i32
    %c0_i32_0 = arith.constant 0 : i32
    %c0_i32_1 = arith.constant 0 : i32
    return %c0_i32, %c0_i32_0 : i32, i32
  }
  func.func @transform_2(%arg0: i32, %arg1: memref<2x8xi32, #tpu.memory_space<smem>>) -> (i32, i32) {
    %c0_i32 = arith.constant 0 : i32
    %c0_i32_0 = arith.constant 0 : i32
    %c0_i32_1 = arith.constant 0 : i32
    return %c0_i32, %c0_i32_0 : i32, i32
  }
  func.func @transform_3(%arg0: i32, %arg1: memref<2x8xi32, #tpu.memory_space<smem>>) -> (i32, i32) {
    %c0_i32 = arith.constant 0 : i32
    %c0_i32_0 = arith.constant 0 : i32
    %c0_i32_1 = arith.constant 0 : i32
    return %c0_i32, %c0_i32_0 : i32, i32
  }
  func.func @transform_4(%arg0: i32, %arg1: memref<2x8xi32, #tpu.memory_space<smem>>) -> (i32, i32) {
    %c0_i32 = arith.constant 0 : i32
    %c0_i32_0 = arith.constant 0 : i32
    %c0_i32_1 = arith.constant 0 : i32
    return %c0_i32, %c0_i32_0 : i32, i32
  }
}

</mosaic_0001>

<bundles_post_ra>
// kernel: text_classification_forward.1
= control target key start
LH: loop header
LB: loop body
LE: loop exit
PB: predicated region body
PF: predicated region fallthrough
CT: control target
= control target key end

     0   :  { %s796_s0 = inlined_call_operand.vmem [shape: s32[2,8], index: 0, kind: input, shape index: {}]   ;;  %s797_s1 = inlined_call_operand.vmem [shape: f32[100,32], index: 1, kind: input, shape index: {}]   ;;  %s798_s2 = inlined_call_operand.vmem [shape: f32[224,32], index: 2, kind: input, shape index: {}]   ;;  %s799_s3 = inlined_call_operand.vmem [shape: f32[32,4], index: 3, kind: input, shape index: {}]   ;;  %s800_s4 = inlined_call_operand.vmem [shape: f32[1,128], index: 4, kind: input, shape index: {}]   ;;  %s801_s5 = inlined_call_operand.vmem [shape: f32[2,128], index: 5, kind: output, shape index: {}]  }
   0x1   :  { %s10_s20 = sshll.u32 %s796_s0, 4  ;;  %s11_s20 = int_to_ptr.vmem [resolvable:$true] %s10_s20 }
   0x2   :  { %s500_s21 = scalar_lea.vmem %s11_s20, 32  ;;  %p505_p1 = scmp.lt.s32.totalorder %s11_s20, %s11_s20 }
   0x3   :  { %p501_p0 = scmp.ne.s32.totalorder %s11_s20, %s500_s21  ;;  %p506_p2 = scmp.lt.s32.totalorder %s500_s21, %s500_s21 }
   0x5   :  { %p507_p3 = por %p506_p2, %p505_p1 }
   0x7   :  { %p508_p4 = pnand %p507_p3, %p501_p0 }
   0x9   :  { %511 = shalt.err (!%p508_p4)  }
   0xa   :  { %s514_s22 = smov [#allocation4]  }
   0xb   :  { %13 = dma.vmem_to_smem %s11_s20, 32, %s514_s22, [#allocation3] }
   0xc   :  { %512 = dma.done.wait [#allocation3], 32 }
   0xd   :  { %513 = vsyncadd [#allocation3], 4294967264 }
   0xe   :  { %15 = sfence }
   0xf   :  { %vm24_vm0 = vcmask 261120   ;;  %s555_s23 = sld [smem:[#allocation4]]  ;;  %v515_v0 = vmov 0.0   ;;  %s563_s0 = sld [smem:[#allocation4 + $0x1]]  ;;  %vm28_vm1 = vcmask 257024   ;;  %v516_v1 = vmov 0.0|0.0  }
  0x10   :  { %25 = vst.msk [vmem:[#allocation2] sm:$0xff] %vm24_vm0, %v515_v0  ;;  %26 = vst.msk [vmem:[#allocation2 + $0x8] sm:$0xff] %vm24_vm0, %v515_v0  ;;  %s565_s24 = sld [smem:[#allocation4 + $0x2]]  ;;  %s567_s25 = sld [smem:[#allocation4 + $0x3]]  ;;  %434 = vmatprep.subr.bf16.mxu0 %v516_v1  ;;  %v161_v2 = vld [vmem:[%s798_s2] sm:$0xff]  ;;  %v162_v3 = vld [vmem:[%s798_s2 + $0x8] sm:$0xff]  ;;  %476 = vmatprep.subr.bf16.mxu1 %v516_v1 }
  0x11   :  { %27 = vst.msk [vmem:[#allocation2 + $0x10] sm:$0xff] %vm24_vm0, %v515_v0  ;;  %s569_s26 = sld [smem:[#allocation4 + $0x4]]  ;;  %s580_s6 = sld [smem:[#allocation4 + $0x5]]  ;;  %v435_v4 = vpack.c.bf16 %v162_v3, %v161_v2  ;;  %v163_v5 = vld [vmem:[%s798_s2 + $0x10] sm:$0xff]  ;;  %v164_v6 = vld [vmem:[%s798_s2 + $0x18] sm:$0xff]  ;;  %vm33_vm2 = vcmask 253952  }
  0x12   :  { %29 = vst.msk [vmem:[#allocation2 + $0x18] sm:$0xf] %vm28_vm1, %v515_v0  ;;  %s582_s7 = sld [smem:[#allocation4 + $0x6]]  ;;  %s590_s12 = sld [smem:[#allocation4 + $0x80]]  ;;  %v438_v7 = vpack.c.bf16 %v164_v6, %v163_v5  ;;  %v165_v8 = vld [vmem:[%s798_s2 + $0x20] sm:$0xff]  ;;  %v166_v9 = vld [vmem:[%s798_s2 + $0x28] sm:$0xff] }
  0x13   :  { %s592_s13 = sld [smem:[#allocation4 + $0x81]]  ;;  %s594_s14 = sld [smem:[#allocation4 + $0x82]]  ;;  %436 = vmatpush1.bf16.msra.mxu0 %v435_v4  ;;  %v441_v15 = vpack.c.bf16 %v166_v9, %v165_v8  ;;  %v167_v16 = vld [vmem:[%s798_s2 + $0x30] sm:$0xff]  ;;  %v168_v19 = vld [vmem:[%s798_s2 + $0x38] sm:$0xff]  ;;  %v169_v26 = vld [vmem:[%s798_s2 + $0x40] sm:$0xff]  ;;  %vm125_vm3 = vcmask 785408  }
  0x14   :  { %s596_s15 = sld [smem:[#allocation4 + $0x83]]  ;;  %s602_s19 = sld [smem:[#allocation4 + $0x84]]  ;;  %437 = vmatprep.subr.bf16.mxu0 %v516_v1  ;;  %v444_v25 = vpack.c.bf16 %v168_v19, %v167_v16  ;;  %v170_v27 = vld [vmem:[%s798_s2 + $0x48] sm:$0xff]  ;;  %v171_v29 = vld [vmem:[%s798_s2 + $0x50] sm:$0xff]  ;;  %v172_v30 = vld [vmem:[%s798_s2 + $0x58] sm:$0xff]  ;;  %vm123_vm4 = vcmask 523264  }
  0x15   :  { %s31_s18 = scalar_lea.vmem %s797_s1, %s555_s23  ;;  %s36_s30 = scalar_lea.vmem %s797_s1, %s563_s0  ;;  %v447_v28 = vpack.c.bf16 %v170_v27, %v169_v26  ;;  %v450_v35 = vpack.c.bf16 %v172_v30, %v171_v29  ;;  %v173_v36 = vld [vmem:[%s798_s2 + $0x60] sm:$0xff]  ;;  %v174_v37 = vld [vmem:[%s798_s2 + $0x68] sm:$0xff]  ;;  %v175_v41 = vld [vmem:[%s798_s2 + $0x70] sm:$0xff]  ;;  %vm520_vm5 = vmmov 0   ;;  %vm284_vm6 = vcmask 1040384  }
  0x16   :  { %v32_v10 = vld [vmem:[%s31_s18] sm:$0x1]  ;;  %s40_s9 = scalar_lea.vmem %s797_s1, %s565_s24  ;;  %s44_s16 = scalar_lea.vmem %s797_s1, %s567_s25  ;;  %v453_v39 = vpack.c.bf16 %v174_v37, %v173_v36  ;;  %v176_v42 = vld [vmem:[%s798_s2 + $0x78] sm:$0xff]  ;;  %v178_v49 = vld [vmem:[%s798_s2 + $0x88] sm:$0xff]  ;;  %431 = vmatprep.mubr.msk.f32.mxu1 %vm520_vm5, %v515_v0  ;;  %vm366_vm7 = vcmask 31744   ;;  %vm368_vm8 = vcmask 293888  }
  0x17   :  { %34 = vst.msk [vmem:[#allocation2 + $0x3] sm:$0x1] %vm33_vm2, %v32_v10  ;;  %v37_v11 = vld [vmem:[%s36_s30] sm:$0x1]  ;;  %s48_s18 = scalar_lea.vmem %s797_s1, %s569_s26  ;;  %s52_s21 = scalar_lea.vmem %s797_s1, %s580_s6  ;;  %439 = vmatpush1.bf16.msra.mxu0 %v438_v7  ;;  %v456_v47 = vpack.c.bf16 %v176_v42, %v175_v41  ;;  %v179_v53 = vld [vmem:[%s798_s2 + $0x90] sm:$0xff]  ;;  %v180_v54 = vld [vmem:[%s798_s2 + $0x98] sm:$0xff] }
  0x18   :  { %v41_v12 = vld [vmem:[%s40_s9] sm:$0x1]  ;;  %38 = vst.msk [vmem:[#allocation2 + $0x4] sm:$0x1] %vm33_vm2, %v37_v11  ;;  %s56_s28 = scalar_lea.vmem %s797_s1, %s582_s7  ;;  %s64_s30 = scalar_lea.vmem %s797_s1, %s590_s12  ;;  %440 = vmatprep.subr.bf16.mxu0 %v516_v1  ;;  %v462_v57 = vpack.c.bf16 %v180_v54, %v179_v53  ;;  %v182_v59 = vld [vmem:[%s798_s2 + $0xa8] sm:$0xff]  ;;  %v183_v63 = vld [vmem:[%s798_s2 + $0xb0] sm:$0xff] }
  0x19   :  { %42 = vst.msk [vmem:[#allocation2 + $0x5] sm:$0x1] %vm33_vm2, %v41_v12  ;;  %v45_v13 = vld [vmem:[%s44_s16] sm:$0x1]  ;;  %s68_s8 = scalar_lea.vmem %s797_s1, %s592_s13  ;;  %s72_s12 = scalar_lea.vmem %s797_s1, %s594_s14  ;;  %v184_v2 = vld [vmem:[%s798_s2 + $0xb8] sm:$0xff]  ;;  %v186_v5 = vld [vmem:[%s798_s2 + $0xc8] sm:$0xff] }
  0x1a   :  { %v49_v14 = vld [vmem:[%s48_s18] sm:$0x1]  ;;  %46 = vst.msk [vmem:[#allocation2 + $0x6] sm:$0x1] %vm33_vm2, %v45_v13  ;;  %s76_s13 = scalar_lea.vmem %s797_s1, %s596_s15  ;;  %s80_s24 = scalar_lea.vmem %s797_s1, %s602_s19  ;;  %v468_v3 = vpack.c.bf16 %v184_v2, %v183_v63  ;;  %v187_v7 = vld [vmem:[%s798_s2 + $0xd0] sm:$0xff]  ;;  %v188_v8 = vld [vmem:[%s798_s2 + $0xd8] sm:$0xff] }
  0x1b   :  { %50 = vst.msk [vmem:[#allocation2 + $0x7] sm:$0x1] %vm33_vm2, %v49_v14  ;;  %v53_v17 = vld [vmem:[%s52_s21] sm:$0x1]  ;;  %s411_s21 = sld [smem:[#allocation4 + $0x85]]  ;;  %s412_s14 = sld [smem:[#allocation4 + $0x86]]  ;;  %442 = vmatpush1.bf16.msra.mxu0 %v441_v15  ;;  %v474_v9 = vpack.c.bf16 %v188_v8, %v187_v7 }
  0x1c   :  { %v57_v18 = vld [vmem:[%s56_s28] sm:$0x1]  ;;  %54 = vst.msk [vmem:[#allocation2 + $0x8] sm:$0x1] %vm33_vm2, %v53_v17  ;;  %s405_s15 = sld [smem:[#allocation4 + $0x7]]  ;;  %443 = vmatprep.subr.bf16.mxu0 %v516_v1  ;;  %s517_s28 = smov 32  }
  0x1d   :  { %58 = vst.msk [vmem:[#allocation2 + $0x9] sm:$0x1] %vm33_vm2, %v57_v18  ;;  %v65_v20 = vld [vmem:[%s64_s30] sm:$0x1]  ;;  %s413_s22 = sld [smem:[#allocation4 + $0x87]]  ;;  %s519_s9 = smov 96  }
  0x1e   :  { %v69_v21 = vld [vmem:[%s68_s8] sm:$0x1]  ;;  %66 = vst.msk [vmem:[#allocation2 + $0x11] sm:$0x1] %vm33_vm2, %v65_v20  ;;  %v287_v37 = vld [vmem:[%s799_s3 + $0x8] sm:$0xff] }
  0x1f   :  { %70 = vst.msk [vmem:[#allocation2 + $0x12] sm:$0x1] %vm33_vm2, %v69_v21  ;;  %v73_v22 = vld [vmem:[%s72_s12] sm:$0x1]  ;;  %445 = vmatpush1.bf16.msra.mxu0 %v444_v25 }
  0x20   :  { %v77_v23 = vld [vmem:[%s76_s13] sm:$0x1]  ;;  %74 = vst.msk [vmem:[#allocation2 + $0x13] sm:$0x1] %vm33_vm2, %v73_v22  ;;  %446 = vmatprep.subr.bf16.mxu0 %v516_v1 }
  0x21   :  { %78 = vst.msk [vmem:[#allocation2 + $0x14] sm:$0x1] %vm33_vm2, %v77_v23  ;;  %v81_v24 = vld [vmem:[%s80_s24] sm:$0x1]  ;;  %s84_s29 = scalar_lea.vmem %s797_s1, %s411_s21  ;;  %s88_s11 = scalar_lea.vmem %s797_s1, %s412_s14 }
  0x22   :  { %82 = vst.msk [vmem:[#allocation2 + $0x15] sm:$0x1] %vm33_vm2, %v81_v24  ;;  %v85_v31 = vld [vmem:[%s84_s29] sm:$0x1]  ;;  %s60_s17 = scalar_lea.vmem %s797_s1, %s405_s15  ;;  %s518_s29 = smov 64  }
  0x23   :  { %86 = vst.msk [vmem:[#allocation2 + $0x16] sm:$0x1] %vm33_vm2, %v85_v31  ;;  %v89_v32 = vld [vmem:[%s88_s11] sm:$0x1]  ;;  %s92_s18 = scalar_lea.vmem %s797_s1, %s413_s22  ;;  %448 = vmatpush1.bf16.msra.mxu0 %v447_v28  ;;  %v96_v38 = vld [vmem:[#allocation2 + $0x1] sm:$0xff] }
  0x24   :  { %90 = vst.msk [vmem:[#allocation2 + $0x17] sm:$0x1] %vm33_vm2, %v89_v32  ;;  %v61_v33 = vld [vmem:[%s60_s17] sm:$0x1]  ;;  %449 = vmatprep.subr.bf16.mxu0 %v516_v1  ;;  %v97_v40 = vld [vmem:[#allocation2 + $0x2] sm:$0xff] }
  0x25   :  { %v93_v34 = vld [vmem:[%s92_s18] sm:$0x1]  ;;  %62 = vst.msk [vmem:[#allocation2 + $0xa] sm:$0x1] %vm33_vm2, %v61_v33 }
  0x26   :  { %94 = vst.msk [vmem:[#allocation2 + $0x18] sm:$0x1] %vm33_vm2, %v93_v34  ;;  %v177_v48 = vld [vmem:[%s798_s2 + $0x80] sm:$0xff] }
  0x27   :  { %451 = vmatpush1.bf16.msra.mxu0 %v450_v35  ;;  %v459_v52 = vpack.c.bf16 %v178_v49, %v177_v48  ;;  %v181_v58 = vld [vmem:[%s798_s2 + $0xa0] sm:$0xff] }
  0x28   :  { %452 = vmatprep.subr.bf16.mxu0 %v516_v1  ;;  %v465_v62 = vpack.c.bf16 %v182_v59, %v181_v58  ;;  %v185_v4 = vld [vmem:[%s798_s2 + $0xc0] sm:$0xff] }
  0x29   :  { %v471_v6 = vpack.c.bf16 %v186_v5, %v185_v4  ;;  %v95_v14 = vld [vmem:[#allocation2] sm:$0xff]  ;;  %v129_v22 = vld [vmem:[#allocation2 + $0xe] sm:$0xff] }
  0x2a   :  { %v130_v43 = vld [vmem:[#allocation2 + $0xf] sm:$0xff]  ;;  %v286_v36 = vld [vmem:[%s799_s3] sm:$0xff] }
  0x2b   :  { %v131_v44 = vld [vmem:[#allocation2 + $0x10] sm:$0xff]  ;;  %v490_v45 = vpack.i.bf16 %v130_v43, %v96_v38  ;;  %454 = vmatpush1.bf16.msra.mxu0 %v453_v39  ;;  %v477_v38 = vpack.c.bf16 %v287_v37, %v286_v36 }
  0x2c   :  { %v495_v46 = vpack.i.bf16 %v131_v44, %v97_v40  ;;  %455 = vmatprep.subr.bf16.mxu0 %v516_v1  ;;  %v100_v50 = vld [vmem:[#allocation2 + $0x5] sm:$0xff]  ;;  %v288_v39 = vld [vmem:[%s799_s3 + $0x10] sm:$0xff]  ;;  %v289_v40 = vld [vmem:[%s799_s3 + $0x18] sm:$0xff]  ;;  %s521_s3 = smov 4  }
  0x2d   :  { %491 = vrot.lane.b32.xlu0 %v490_v45, %s517_s28  ;;  %v101_v51 = vld [vmem:[#allocation2 + $0x6] sm:$0xff]  ;;  %v134_v56 = vld [vmem:[#allocation2 + $0x13] sm:$0xff]  ;;  %478 = vmatpush3.bf16.msra.mxu1 %v477_v38  ;;  %v480_v41 = vpack.c.bf16 %v289_v40, %v288_v39 }
  0x2e   :  { %496 = vrot.lane.b32.xlu1 %v495_v46, %s518_s29  ;;  %v98_v55 = vld [vmem:[#allocation2 + $0x3] sm:$0xff]  ;;  %v135_v60 = vld [vmem:[#allocation2 + $0x14] sm:$0xff]  ;;  %479 = vmatprep.subr.bf16.mxu1 %v516_v1 }
  0x2f   :  { %457 = vmatpush1.bf16.msra.mxu0 %v456_v47  ;;  %v132_v61 = vld [vmem:[#allocation2 + $0x11] sm:$0xff]  ;;  %v99_v13 = vld [vmem:[#allocation2 + $0x4] sm:$0xff] }
  0x30   :  { %458 = vmatprep.subr.bf16.mxu0 %v516_v1  ;;  %v133_v26 = vld [vmem:[#allocation2 + $0x12] sm:$0xff] }
  0x31   :  { %115 = vrot.lane.b32.xlu0 %v100_v50, %s517_s28  ;;  %481 = vmatpush3.bf16.msra.mxu1 %v480_v41 }
  0x32   :  { %119 = vrot.lane.b32.xlu1 %v101_v51, %s518_s29 }
  0x33   :  { %460 = vmatpush1.bf16.msra.mxu0 %v459_v52 }
  0x34   :  { %461 = vmatprep.subr.bf16.mxu0 %v516_v1 }
  0x35   :  { %111 = vrot.lane.b32.xlu0 %v98_v55, %s519_s9 }
  0x36   :  { %149 = vrot.lane.b32.xlu1 %v134_v56, %s517_s28 }
  0x37   :  { %463 = vmatpush1.bf16.msra.mxu0 %v462_v57 }
  0x38   :  { %464 = vmatprep.subr.bf16.mxu0 %v516_v1 }
  0x39   :  { %153 = vrot.lane.b32.xlu0 %v135_v60, %s518_s29 }
  0x3a   :  { %145 = vrot.lane.b32.xlu1 %v132_v61, %s519_s9  ;;  %v417_v61 = vld [vmem:[%s800_s4] ss:$0 sm:$0xff] }
  0x3b   :  { %466 = vmatpush1.bf16.msra.mxu0 %v465_v62 }
  0x3c   :  { %467 = vmatprep.subr.bf16.mxu0 %v516_v1 }
  0x3f   :  { %469 = vmatpush1.bf16.msra.mxu0 %v468_v3 }
  0x40   :  { %470 = vmatprep.subr.bf16.mxu0 %v516_v1 }
  0x43   :  { %472 = vmatpush1.bf16.msra.mxu0 %v471_v6 }
  0x44   :  { %473 = vmatprep.subr.bf16.mxu0 %v516_v1 }
  0x47   :  { %475 = vmatpush1.bf16.msra.mxu0 %v474_v9 }
  0x9f   :  { %v492_v10 = vpop.permute.xlu0 %491 }
  0xa0   :  { %v497_v11 = vpop.permute.xlu1 %496  ;;  %v493_v12 = vunpack.i.l.bf16 %v492_v10  ;;  %v494_v20 = vunpack.i.h.bf16 %v492_v10 }
  0xa1   :  { %v498_v15 = vunpack.i.l.bf16 %v497_v11  ;;  %v499_v25 = vunpack.i.h.bf16 %v497_v11 }
  0xa2   :  { %v122_v19 = vsel %vm24_vm0, %v95_v14, %v493_v12  ;;  %v156_v29 = vsel %vm24_vm0, %v129_v22, %v494_v20 }
  0xa3   :  { %v116_v16 = vpop.permute.xlu0 %115  ;;  %v124_v24 = vsel %vm123_vm4, %v122_v19, %v498_v15  ;;  %v157_v34 = vsel %vm123_vm4, %v156_v29, %v499_v25 }
  0xa4   :  { %v120_v17 = vpop.permute.xlu1 %119  ;;  %v127_v18 = vsel %vm24_vm0, %v99_v13, %v116_v16 }
  0xa5   :  { %v128_v21 = vsel %vm123_vm4, %v127_v18, %v120_v17 }
  0xa6   :  { %414 = vmatprep.mubr.msk.f32.mxu0 %vm125_vm3, %v128_v21 }
  0xa7   :  { %v112_v23 = vpop.permute.xlu0 %111 }
  0xa8   :  { %v150_v27 = vpop.permute.xlu1 %149  ;;  %v126_v28 = vsel %vm125_vm3, %v124_v24, %v112_v23 }
  0xa9   :  { %260 = vmatmul.mubr.f32.vlgmr.msra.gmra.mrb[0].mxu0 %v126_v28  ;;  %v159_v30 = vsel %vm24_vm0, %v133_v26, %v150_v27 }
  0xab   :  { %v154_v31 = vpop.permute.xlu0 %153 }
  0xac   :  { %v146_v32 = vpop.permute.xlu1 %145  ;;  %v160_v33 = vsel %vm123_vm4, %v159_v30, %v154_v31 }
  0xad   :  { %415 = vmatprep.mubr.msk.f32.mxu0 %vm125_vm3, %v160_v33  ;;  %v158_v35 = vsel %vm125_vm3, %v157_v34, %v146_v32 }
  0xae   :  { %265 = vmatmul.mubr.f32.gmra.mrb[2].mxu0 %v158_v35 }
 0x17c   :  { %v261_v42 = vpop.f32.mrb[0].mxu0 }
 0x17d   :  { %v270_v43 = vsel %vm24_vm0, %v261_v42, -inf  ;;  %v263_v44 = vpop.f32.mrb[1].mxu0 }
 0x17e   :  { %v271_v45 = vrot.slane %v270_v43, 4 }
 0x180   :  { %v272_v46 = vmax.f32 %v270_v43, %v271_v45 }
 0x181   :  { %v266_v1 = vpop.f32.mrb[2].mxu0 }
 0x182   :  { %v273_v47 = vrot.slane %v272_v46, 2  ;;  %v277_v48 = vsel %vm24_vm0, %v266_v1, -inf  ;;  %v268_v49 = vpop.f32.mrb[3].mxu0 }
 0x183   :  { %v278_v50 = vrot.slane %v277_v48, 4 }
 0x184   :  { %v274_v51 = vmax.f32 %v272_v46, %v273_v47 }
 0x185   :  { %v279_v52 = vmax.f32 %v277_v48, %v278_v50 }
 0x186   :  { %v275_v54 = vrot.slane %v274_v51, 1 }
 0x187   :  { %v280_v53 = vrot.slane %v279_v52, 2 }
 0x188   :  { %v276_v0 = vmax.f32 %v274_v51, %v275_v54 }
 0x189   :  { %v281_v55 = vmax.f32 %v279_v52, %v280_v53 }
 0x18b   :  { %v282_v56 = vrot.slane %v281_v55, 1 }
 0x18d   :  { %v283_v57 = vmax.f32 %v281_v55, %v282_v56 }
 0x18f   :  { %v285_v58 = vsel %vm284_vm6, %v276_v0, %v283_v57 }
 0x190   :  { %363 = vrot.lane.b32.xlu0 %v285_v58, %s521_s3  ;;  %432 = vmatmul.mubr.msk.f32.vlgmr.msra.gmra.mrb[0].mxu1 %vm24_vm0, %v285_v58 }
 0x202   :  { %v364_v59 = vpop.permute.xlu0 %363 }
 0x263   :  { %v359_v60 = vpop.f32.mrb[0].mxu1 }
 0x264   :  { %v367_v62 = vsel %vm366_vm7, %v359_v60, %v364_v59  ;;  %v433_v63 = vpop.f32.mrb[1].mxu1 }
 0x265   :  { %v369_v2 = vsel %vm368_vm8, %v367_v62, 0.0 }
 0x266   :  { %v377_v3 = vadd.f32 %v417_v61, %v369_v2 }
 0x268   :  { %378 = vst [vmem:[%s801_s5] sm:$0x3] %v377_v3 }

</bundles_post_ra>
